<compile_context>
chip_gen: v6e
topology: v6e:2x2x1
jax: 0.10.0
libtpu: 0.0.40
codegen_flags: <defaults>
</compile_context>

<pallas_src>
import functools
import math

import jax
import jax.numpy as jnp
from jax.experimental import pallas as pl
from jax.experimental.pallas import tpu as pltpu

_MIB = 1024 * 1024


def _round_up(x, m):
    return ((x + m - 1) // m) * m


def _pad2d(arr, rows, cols):
    r0, c0 = arr.shape
    if (r0, c0) == (rows, cols):
        return arr
    return jnp.pad(arr, ((0, rows - r0), (0, cols - c0)))


def _pick_tile(dim_padded, t_max, align):
    """Largest tile <= ~t_max (multiple of `align`) that evenly covers dim."""
    if dim_padded <= t_max:
        return dim_padded
    n_chunks = -(-dim_padded // t_max)
    return _round_up(-(-dim_padded // n_chunks), align)


def _sublane_align(dtype):
    # f32 -> 8 rows, bf16 -> 16, int8/fp8 -> 32.
    return 8 * max(1, 4 // jnp.dtype(dtype).itemsize)


def _vmem_cap_bytes():
    """Generation-aware VMEM budget: half of physical, ceiling 48 MiB.

    v5e/v6e (128 MiB physical) -> 48 MiB; v7x (64 MiB physical) -> 32 MiB.
    """
    cap = 128 * _MIB
    try:
        cap = int(pltpu.get_tpu_info().vmem_capacity_bytes)
    except Exception:
        pass
    return min(cap // 2, 48 * _MIB)


# --------------------------------------------------------------------------
# Kernels
# --------------------------------------------------------------------------
def _lora_linear_kernel(scale_ref, x_ref, w_ref, b_ref, a_ref, bup_ref,
                        o_ref, down_ref, *acc_scratch, single_k):
    """One (i, j, k) grid step of y = x @ W + b + scaling * (x @ A) @ Bup.

    Per-tile shapes:
      scale_ref: (1,)  f32 SMEM   LoRA scaling
      x_ref:     (tm, tk)         activations
      w_ref:     (tk, tn)         frozen base weight (pre-transposed)
      b_ref:     (1,  tn) f32     frozen base bias
      a_ref:     (tk, r_pad)      LoRA down projection (pre-transposed, padded)
      bup_ref:   (r_pad, tn)      LoRA up projection (pre-transposed, padded)
      o_ref:     (tm, tn)         output tile
      down_ref:  (tm, r_pad) f32  LoRA down accumulator (persists across j)
      acc_scratch: optional (tm, tn) f32 base-path accumulator (multi-K only)
    """
    j = pl.program_id(1)
    k = pl.program_id(2)
    nk = pl.num_programs(2)
    x = x_ref[...]

    # --- LoRA down path: computed only on the first N tile; the scratch
    # persists across the j axis so later N tiles reuse it in the epilogue.
    @pl.when((j == 0) & (k == 0))
    def _():
        down_ref[...] = jnp.zeros_like(down_ref)

    @pl.when(j == 0)
    def _():
        down_ref[...] += jnp.dot(x, a_ref[...],
                                 preferred_element_type=jnp.float32)

    @pl.when((j == 0) & (k == nk - 1))
    def _():
        # Apply scaling once to the (tm, r_pad) intermediate (r << D_out).
        down_ref[...] = down_ref[...] * scale_ref[0]

    def _finish(base_f32):
        up = jnp.dot(down_ref[...].astype(bup_ref.dtype), bup_ref[...],
                     preferred_element_type=jnp.float32)
        o_ref[...] = (base_f32 + up + b_ref[...]).astype(o_ref.dtype)

    if single_k:
        # K fits in one tile: no (tm, tn) accumulator round-trip through VMEM.
        _finish(jnp.dot(x, w_ref[...], preferred_element_type=jnp.float32))
    else:
        acc_ref, = acc_scratch

        @pl.when(k == 0)
        def _():
            acc_ref[...] = jnp.zeros_like(acc_ref)

        acc_ref[...] += jnp.dot(x, w_ref[...],
                                preferred_element_type=jnp.float32)

        @pl.when(k == nk - 1)
        def _():
            _finish(acc_ref[...])


def _linear_kernel(x_ref, w_ref, b_ref, o_ref, *acc_scratch, single_k):
    """Plain tiled matmul + bias (merged-weight LoRA inference path)."""
    k = pl.program_id(2)
    nk = pl.num_programs(2)
    if single_k:
        o_ref[...] = (jnp.dot(x_ref[...], w_ref[...],
                              preferred_element_type=jnp.float32)
                      + b_ref[...]).astype(o_ref.dtype)
    else:
        acc_ref, = acc_scratch

        @pl.when(k == 0)
        def _():
            acc_ref[...] = jnp.zeros_like(acc_ref)

        acc_ref[...] += jnp.dot(x_ref[...], w_ref[...],
                                preferred_element_type=jnp.float32)

        @pl.when(k == nk - 1)
        def _():
            o_ref[...] = (acc_ref[...] + b_ref[...]).astype(o_ref.dtype)


# --------------------------------------------------------------------------
# Wrapper-side weight preparation (do ONCE per LoRA load, cache the result)
# --------------------------------------------------------------------------
def prepare_lora_params(w, b, lora_down, lora_up, scaling, *,
                        compute_dtype=None, merge_weights=False,
                        tn_max=1024, tk_max=2048):
    """One-time weight prep: transpose, cast, pad, optionally fold LoRA.

    w:         (D_out, D_in)  original_layer.weight
    b:         (D_out,)       original_layer.bias
    lora_down: (r, D_in)      LoRA down-projection weight
    lora_up:   (D_out, r)     LoRA up-projection weight
    scaling:   LoRA scaling (alpha / r); Python float or jax scalar.
    """
    d_out, d_in = w.shape
    r = lora_down.shape[0]
    cdt = jnp.dtype(compute_dtype if compute_dtype is not None else w.dtype)

    kp_min = _round_up(d_in, 128)
    np_min = _round_up(d_out, 128)
    tk = _pick_tile(kp_min, tk_max, 128)
    tn = _pick_tile(np_min, tn_max, 128)
    kp = _round_up(kp_min, tk)
    np_ = _round_up(np_min, tn)
    r_pad = _round_up(r, 128)   # lane-dense rank dim (no masked partial stores)

    w_t = jnp.asarray(w).T            # (D_in, D_out)
    a_t = jnp.asarray(lora_down).T    # (D_in, r)
    bup_t = jnp.asarray(lora_up).T    # (r, D_out)

    params = dict(
        merge=bool(merge_weights), cdt=cdt,
        d_in=int(d_in), d_out=int(d_out),
        tk=int(tk), tn=int(tn), kp=int(kp), np=int(np_), r_pad=int(r_pad),
        bias=_pad2d(jnp.asarray(b, jnp.float32).reshape(1, d_out), 1, np_),
    )
    if merge_weights:
        # Fold LoRA into the base weight once (frozen-LoRA inference path).
        w_eff = (w_t.astype(jnp.float32)
                 + jnp.asarray(scaling, jnp.float32)
                 * jnp.dot(a_t.astype(jnp.float32), bup_t.astype(jnp.float32)))
        params["w"] = _pad2d(w_eff.astype(cdt), kp, np_)
    else:
        params["w"] = _pad2d(w_t.astype(cdt), kp, np_)
        params["a"] = _pad2d(a_t.astype(cdt), kp, r_pad)
        params["bup"] = _pad2d(bup_t.astype(cdt), r_pad, np_)
        params["scale"] = jnp.asarray(scaling, jnp.float32).reshape(1)
    return params


# --------------------------------------------------------------------------
# Forward
# --------------------------------------------------------------------------
def lora_wrapper_forward(x, params, *, tm_max=512):
    """y = original_layer(x) + lora(x), with params from prepare_lora_params."""
    lead = x.shape[:-1]
    d_in, d_out = params["d_in"], params["d_out"]
    assert x.shape[-1] == d_in, "input feature dim mismatch"
    cdt = params["cdt"]
    merge = params["merge"]
    tk, tn, kp, np_, r_pad = (params["tk"], params["tn"], params["kp"],
                              params["np"], params["r_pad"])
    out_dtype = x.dtype

    m = int(math.prod(lead)) if lead else 1
    x2d = x.reshape(m, d_in)
    if x2d.dtype != cdt:
        # TODO(synk): fuse this cast into the upstream producer to avoid an
        # extra HBM round-trip for the activations.
        x2d = x2d.astype(cdt)

    single_k = (kp // tk) == 1
    in_bytes = jnp.dtype(cdt).itemsize
    out_bytes = jnp.dtype(out_dtype).itemsize
    cap = _vmem_cap_bytes()

    sub = _sublane_align(cdt)
    mp_min = _round_up(m, sub)
    tm = _pick_tile(mp_min, max(tm_max, sub), sub)

    def _est_bytes(tm_):
        ins = (tm_ * tk + tk * tn) * in_bytes + tn * 4
        scr = 0
        if not merge:
            ins += (tk * r_pad + r_pad * tn) * in_bytes
            scr += tm_ * r_pad * 4
        if not single_k:
            scr += tm_ * tn * 4
        return 2 * (ins + tm_ * tn * out_bytes) + scr

    # Shrink the M tile until the double-buffered footprint fits the
    # generation-aware VMEM budget (v7x ~32 MiB; v5e/v6e 48 MiB).
    while _est_bytes(tm) > cap and tm > 2 * sub:
        tm = max(_round_up(tm // 2, sub), sub)

    mp = _round_up(mp_min, tm)
    if (mp, kp) != (m, d_in):               # only copy/pad when required
        x2d = _pad2d(x2d, mp, kp)

    grid = (mp // tm, np_ // tn, kp // tk)
    vmem_limit = int(min(max(_est_bytes(tm) * 5 // 4, 16 * _MIB), cap))

    if merge:
        kernel = functools.partial(_linear_kernel, single_k=single_k)
        out2d = pl.pallas_call(
            kernel,
            out_shape=jax.ShapeDtypeStruct((mp, np_), out_dtype),
            grid_spec=pltpu.PrefetchScalarGridSpec(
                num_scalar_prefetch=0,
                grid=grid,
                in_specs=[
                    pl.BlockSpec((tm, tk), lambda i, j, k: (i, k)),   # x
                    pl.BlockSpec((tk, tn), lambda i, j, k: (k, j)),   # W_eff
                    pl.BlockSpec((1, tn), lambda i, j, k: (0, j)),    # bias
                ],
                out_specs=pl.BlockSpec((tm, tn), lambda i, j, k: (i, j)),
                scratch_shapes=([] if single_k
                                else [pltpu.VMEM((tm, tn), jnp.float32)]),
            ),
            compiler_params=pltpu.CompilerParams(
                dimension_semantics=("parallel", "parallel", "arbitrary"),
                vmem_limit_bytes=vmem_limit),
        )(x2d, params["w"], params["bias"])
    else:
        kernel = functools.partial(_lora_linear_kernel, single_k=single_k)
        scratch = [pltpu.VMEM((tm, r_pad), jnp.float32)]
        if not single_k:
            scratch.append(pltpu.VMEM((tm, tn), jnp.float32))
        out2d = pl.pallas_call(
            kernel,
            out_shape=jax.ShapeDtypeStruct((mp, np_), out_dtype),
            grid_spec=pltpu.PrefetchScalarGridSpec(
                num_scalar_prefetch=0,
                grid=grid,
                in_specs=[
                    pl.BlockSpec(memory_space=pltpu.MemorySpace.SMEM),   # scale
                    pl.BlockSpec((tm, tk), lambda i, j, k: (i, k)),      # x
                    pl.BlockSpec((tk, tn), lambda i, j, k: (k, j)),      # W^T
                    pl.BlockSpec((1, tn), lambda i, j, k: (0, j)),       # bias
                    pl.BlockSpec((tk, r_pad), lambda i, j, k: (k, 0)),   # A^T
                    pl.BlockSpec((r_pad, tn), lambda i, j, k: (0, j)),   # B^T
                ],
                out_specs=pl.BlockSpec((tm, tn), lambda i, j, k: (i, j)),
                scratch_shapes=scratch,
            ),
            compiler_params=pltpu.CompilerParams(
                # j/k stay "arbitrary": the LoRA-down scratch computed at j==0
                # is reused across later N tiles, so the j axis must run
                # sequentially on one core; only M is sharded across TCs.
                dimension_semantics=("parallel", "arbitrary", "arbitrary"),
                vmem_limit_bytes=vmem_limit),
        )(params["scale"], x2d, params["w"], params["bias"],
          params["a"], params["bup"])

    return out2d[:m, :d_out].reshape(*lead, d_out)


def make_lora_linear(w, b, lora_down, lora_up, scaling, *,
                     compute_dtype=None, merge_weights=False,
                     tm_max=512, tn_max=1024, tk_max=2048):
    """Build a cached LoRAWrapper forward (weight prep happens once here)."""
    params = prepare_lora_params(w, b, lora_down, lora_up, scaling,
                                 compute_dtype=compute_dtype,
                                 merge_weights=merge_weights,
                                 tn_max=tn_max, tk_max=tk_max)
    return functools.partial(lora_wrapper_forward, params=params,
                             tm_max=tm_max)


# --------------------------------------------------------------------------
# Tests
# --------------------------------------------------------------------------
if __name__ == "__main__":
    HI = jax.lax.Precision.HIGHEST

    def reference(x, w, b, lora_down, lora_up, scaling):
        base = jnp.einsum("...d,od->...o", x, w, precision=HI) + b
        down = jnp.einsum("...d,rd->...r", x, lora_down, precision=HI)
        up = jnp.einsum("...r,or->...o", down, lora_up, precision=HI)
        return base + scaling * up

    # --- Test 1: small SD-LoRA-style projection (single tile per axis). ---
    batch, seq, d_in, d_out, rank, alpha = 2, 8, 32, 32, 4, 8
    scaling = alpha / rank
    kx, kw, kb, ka, ku = jax.random.split(jax.random.PRNGKey(0), 5)
    x = jax.random.normal(kx, (batch, seq, d_in), dtype=jnp.float32)
    w = jax.random.normal(kw, (d_out, d_in), dtype=jnp.float32) * 0.05
    b = jax.random.normal(kb, (d_out,), dtype=jnp.float32) * 0.01
    lora_down = jax.random.normal(ka, (rank, d_in), dtype=jnp.float32) * 0.05
    lora_up = jax.random.normal(ku, (d_out, rank), dtype=jnp.float32) * 0.05

    ref = reference(x, w, b, lora_down, lora_up, scaling)

    fwd = make_lora_linear(w, b, lora_down, lora_up, scaling)
    out = jax.block_until_ready(fwd(x))
    assert out.shape == (batch, seq, d_out)
    assert jnp.allclose(out, ref, atol=1e-3, rtol=1e-3), "fused f32 mismatch"

    # Merged-weight inference fast path.
    fwd_m = make_lora_linear(w, b, lora_down, lora_up, scaling,
                             merge_weights=True)
    out_m = jax.block_until_ready(fwd_m(x))
    assert jnp.allclose(out_m, ref, atol=1e-3, rtol=1e-3), "merged mismatch"

    # bf16 I/O with f32 accumulation (deployment configuration).
    fwd_bf = make_lora_linear(w, b, lora_down, lora_up, scaling,
                              compute_dtype=jnp.bfloat16)
    out_bf = jax.block_until_ready(fwd_bf(x))
    assert jnp.allclose(out_bf.astype(jnp.float32), ref,
                        atol=5e-2, rtol=5e-2), "bf16 mismatch"

    # --- Test 2: ragged M + multi-step grid along all three axes
    #     (exercises the K accumulator and the j-hoisted LoRA down reuse). ---
    batch, seq, d_in, d_out, rank, alpha = 2, 23, 320, 192, 4, 8
    scaling = alpha / rank
    kx, kw, kb, ka, ku = jax.random.split(jax.random.PRNGKey(1), 5)
    x = jax.random.normal(kx, (batch, seq, d_in), dtype=jnp.float32)
    w = jax.random.normal(kw, (d_out, d_in), dtype=jnp.float32) * 0.05
    b = jax.random.normal(kb, (d_out,), dtype=jnp.float32) * 0.01
    lora_down = jax.random.normal(ka, (rank, d_in), dtype=jnp.float32) * 0.05
    lora_up = jax.random.normal(ku, (d_out, rank), dtype=jnp.float32) * 0.05

    ref = reference(x, w, b, lora_down, lora_up, scaling)
    fwd_small_tiles = make_lora_linear(w, b, lora_down, lora_up, scaling,
                                       tm_max=16, tn_max=128, tk_max=128)
    out = jax.block_until_ready(fwd_small_tiles(x))
    assert out.shape == (batch, seq, d_out)
    assert jnp.allclose(out, ref, atol=2e-3, rtol=2e-3), "multi-tile mismatch"

    print("KERNEL_OK")
</pallas_src>

<mosaic_0001>
module attributes {stable_mosaic.version = 11 : i64} {
  func.func @_lora_linear_kernel(%arg0: i32, %arg1: i32, %arg2: i32, %arg3: memref<1xf32, #tpu.memory_space<smem>>, %arg4: memref<16x128xf32, #tpu.memory_space<vmem>>, %arg5: memref<128x128xf32, #tpu.memory_space<vmem>>, %arg6: memref<1x128xf32, #tpu.memory_space<vmem>>, %arg7: memref<128x128xf32, #tpu.memory_space<vmem>>, %arg8: memref<128x128xf32, #tpu.memory_space<vmem>>, %arg9: memref<16x128xf32, #tpu.memory_space<vmem>>, %arg10: memref<16x128xf32, #tpu.memory_space<vmem>>) attributes {dimension_semantics = [#tpu.dimension_semantics<parallel>, #tpu.dimension_semantics<arbitrary>, #tpu.dimension_semantics<arbitrary>], iteration_bounds = array<i64: 1, 1, 1>, scalar_prefetch = 0 : i64, scratch_operands = 1 : i64, tpu.core_type = #tpu.core_type<tc>, window_params = [{transform_indices = @transform_0, window_bounds = array<i64: 1>}, {transform_indices = @transform_1, window_bounds = array<i64: 16, 128>}, {transform_indices = @transform_2, window_bounds = array<i64: 128, 128>}, {transform_indices = @transform_3, window_bounds = array<i64: 1, 128>}, {transform_indices = @transform_4, window_bounds = array<i64: 128, 128>}, {transform_indices = @transform_5, window_bounds = array<i64: 128, 128>}, {transform_indices = @transform_6, window_bounds = array<i64: 16, 128>}]} {
    %c0 = arith.constant 0 : index
    %c0_0 = arith.constant 0 : index
    %0 = vector.load %arg4[%c0, %c0_0] : memref<16x128xf32, #tpu.memory_space<vmem>>, vector<16x128xf32>
    %c0_i32 = arith.constant 0 : i32
    %1 = arith.cmpi eq, %arg1, %c0_i32 : i32
    %c0_i32_1 = arith.constant 0 : i32
    %2 = arith.cmpi eq, %arg2, %c0_i32_1 : i32
    %3 = arith.andi %1, %2 : i1
    %4 = arith.extui %3 : i1 to i32
    %c0_i32_2 = arith.constant 0 : i32
    %5 = arith.cmpi ne, %4, %c0_i32_2 : i32
    scf.if %5 {
      %cst_19 = arith.constant 0.000000e+00 : f32
      %24 = vector.broadcast %cst_19 : f32 to vector<16x128xf32>
      %c0_20 = arith.constant 0 : index
      %c0_21 = arith.constant 0 : index
      %25 = vector.load %arg10[%c0_20, %c0_21] : memref<16x128xf32, #tpu.memory_space<vmem>>, vector<16x128xf32>
      tpu.vector_store %arg10[%c0_20, %c0_21], %24 {strides = array<i32>} : memref<16x128xf32, #tpu.memory_space<vmem>>, vector<16x128xf32>,
    } else {
    }
    %c0_i32_3 = arith.constant 0 : i32
    %6 = arith.cmpi eq, %arg1, %c0_i32_3 : i32
    %7 = arith.extui %6 : i1 to i32
    %c0_i32_4 = arith.constant 0 : i32
    %8 = arith.cmpi ne, %7, %c0_i32_4 : i32
    scf.if %8 {
      %c0_19 = arith.constant 0 : index
      %c0_20 = arith.constant 0 : index
      %24 = vector.load %arg10[%c0_19, %c0_20] : memref<16x128xf32, #tpu.memory_space<vmem>>, vector<16x128xf32>
      %c0_21 = arith.constant 0 : index
      %c0_22 = arith.constant 0 : index
      %25 = vector.load %arg7[%c0_21, %c0_22] : memref<128x128xf32, #tpu.memory_space<vmem>>, vector<128x128xf32>
      %cst_23 = arith.constant dense<0.000000e+00> : vector<16x128xf32>
      %26 = tpu.matmul %0, %25, %cst_23 {dimension_numbers = #tpu.dot_dimension_numbers<[1], [0], [0], [1], [0, 0, 1, 1], [], []>} : vector<16x128xf32>, vector<128x128xf32>, vector<16x128xf32> -> vector<16x128xf32>
      %27 = arith.addf %24, %26 : vector<16x128xf32>
      %c0_24 = arith.constant 0 : index
      %c0_25 = arith.constant 0 : index
      %28 = vector.load %arg10[%c0_24, %c0_25] : memref<16x128xf32, #tpu.memory_space<vmem>>, vector<16x128xf32>
      tpu.vector_store %arg10[%c0_24, %c0_25], %27 {strides = array<i32>} : memref<16x128xf32, #tpu.memory_space<vmem>>, vector<16x128xf32>,
    } else {
    }
    %c0_i32_5 = arith.constant 0 : i32
    %9 = arith.cmpi eq, %arg1, %c0_i32_5 : i32
    %c0_i32_6 = arith.constant 0 : i32
    %10 = arith.cmpi eq, %arg2, %c0_i32_6 : i32
    %11 = arith.andi %9, %10 : i1
    %12 = arith.extui %11 : i1 to i32
    %c0_i32_7 = arith.constant 0 : i32
    %13 = arith.cmpi ne, %12, %c0_i32_7 : i32
    scf.if %13 {
      %c0_19 = arith.constant 0 : index
      %c0_20 = arith.constant 0 : index
      %24 = vector.load %arg10[%c0_19, %c0_20] : memref<16x128xf32, #tpu.memory_space<vmem>>, vector<16x128xf32>
      %c0_21 = arith.constant 0 : index
      %25 = memref.load %arg3[%c0_21] : memref<1xf32, #tpu.memory_space<smem>>
      %26 = vector.broadcast %25 : f32 to vector<16x128xf32>
      %27 = arith.mulf %24, %26 : vector<16x128xf32>
      %c0_22 = arith.constant 0 : index
      %c0_23 = arith.constant 0 : index
      %28 = vector.load %arg10[%c0_22, %c0_23] : memref<16x128xf32, #tpu.memory_space<vmem>>, vector<16x128xf32>
      tpu.vector_store %arg10[%c0_22, %c0_23], %27 {strides = array<i32>} : memref<16x128xf32, #tpu.memory_space<vmem>>, vector<16x128xf32>,
    } else {
    }
    %c0_8 = arith.constant 0 : index
    %c0_9 = arith.constant 0 : index
    %14 = vector.load %arg5[%c0_8, %c0_9] : memref<128x128xf32, #tpu.memory_space<vmem>>, vector<128x128xf32>
    %cst = arith.constant dense<0.000000e+00> : vector<16x128xf32>
    %15 = tpu.matmul %0, %14, %cst {dimension_numbers = #tpu.dot_dimension_numbers<[1], [0], [0], [1], [0, 0, 1, 1], [], []>} : vector<16x128xf32>, vector<128x128xf32>, vector<16x128xf32> -> vector<16x128xf32>
    %c0_10 = arith.constant 0 : index
    %c0_11 = arith.constant 0 : index
    %16 = vector.load %arg10[%c0_10, %c0_11] : memref<16x128xf32, #tpu.memory_space<vmem>>, vector<16x128xf32>
    %c0_12 = arith.constant 0 : index
    %c0_13 = arith.constant 0 : index
    %17 = vector.load %arg8[%c0_12, %c0_13] : memref<128x128xf32, #tpu.memory_space<vmem>>, vector<128x128xf32>
    %cst_14 = arith.constant dense<0.000000e+00> : vector<16x128xf32>
    %18 = tpu.matmul %16, %17, %cst_14 {dimension_numbers = #tpu.dot_dimension_numbers<[1], [0], [0], [1], [0, 0, 1, 1], [], []>} : vector<16x128xf32>, vector<128x128xf32>, vector<16x128xf32> -> vector<16x128xf32>
    %19 = arith.addf %15, %18 : vector<16x128xf32>
    %c0_15 = arith.constant 0 : index
    %c0_16 = arith.constant 0 : index
    %20 = vector.load %arg6[%c0_15, %c0_16] : memref<1x128xf32, #tpu.memory_space<vmem>>, vector<1x128xf32>
    %21 = vector.broadcast %20 : vector<1x128xf32> to vector<16x128xf32>
    %22 = arith.addf %19, %21 : vector<16x128xf32>
    %c0_17 = arith.constant 0 : index
    %c0_18 = arith.constant 0 : index
    %23 = vector.load %arg9[%c0_17, %c0_18] : memref<16x128xf32, #tpu.memory_space<vmem>>, vector<16x128xf32>
    tpu.vector_store %arg9[%c0_17, %c0_18], %22 {strides = array<i32>} : memref<16x128xf32, #tpu.memory_space<vmem>>, vector<16x128xf32>,
    return
  }
  func.func @transform_0(%arg0: i32, %arg1: i32, %arg2: i32) -> i32 {
    %c0_i32 = arith.constant 0 : i32
    %c0_i32_0 = arith.constant 0 : i32
    return %c0_i32 : i32
  }
  func.func @transform_1(%arg0: i32, %arg1: i32, %arg2: i32) -> (i32, i32) {
    %c0_i32 = arith.constant 0 : i32
    return %arg0, %arg2 : i32, i32
  }
  func.func @transform_2(%arg0: i32, %arg1: i32, %arg2: i32) -> (i32, i32) {
    %c0_i32 = arith.constant 0 : i32
    return %arg2, %arg1 : i32, i32
  }
  func.func @transform_3(%arg0: i32, %arg1: i32, %arg2: i32) -> (i32, i32) {
    %c0_i32 = arith.constant 0 : i32
    %c0_i32_0 = arith.constant 0 : i32
    return %c0_i32, %arg1 : i32, i32
  }
  func.func @transform_4(%arg0: i32, %arg1: i32, %arg2: i32) -> (i32, i32) {
    %c0_i32 = arith.constant 0 : i32
    %c0_i32_0 = arith.constant 0 : i32
    return %arg2, %c0_i32 : i32, i32
  }
  func.func @transform_5(%arg0: i32, %arg1: i32, %arg2: i32) -> (i32, i32) {
    %c0_i32 = arith.constant 0 : i32
    %c0_i32_0 = arith.constant 0 : i32
    return %c0_i32, %arg1 : i32, i32
  }
  func.func @transform_6(%arg0: i32, %arg1: i32, %arg2: i32) -> (i32, i32) {
    %c0_i32 = arith.constant 0 : i32
    return %arg0, %arg1 : i32, i32
  }
}

</mosaic_0001>

<bundles_post_ra>
// kernel: tpu_custom_call.1
= control target key start
LH: loop header
LB: loop body
LE: loop exit
PB: predicated region body
PF: predicated region fallthrough
CT: control target
= control target key end

     0   :  { %12 = vsyncpa [#allocation5], 0  ;;  %s775_s0 = inlined_call_operand.<no memory space> [shape: f32[1], index: 0, kind: input, shape index: {}]   ;;  %s776_s1 = inlined_call_operand.hbm [shape: f32[16,128], index: 1, kind: input, shape index: {}]   ;;  %s777_s2 = inlined_call_operand.hbm [shape: f32[128,128], index: 2, kind: input, shape index: {}]   ;;  %s778_s3 = inlined_call_operand.vmem [shape: f32[1,128], index: 3, kind: input, shape index: {}]   ;;  %s779_s4 = inlined_call_operand.hbm [shape: f32[128,128], index: 4, kind: input, shape index: {}]   ;;  %s780_s5 = inlined_call_operand.hbm [shape: f32[128,128], index: 5, kind: input, shape index: {}]   ;;  %s781_s6 = inlined_call_operand.hbm [shape: f32[16,128], index: 6, kind: output, shape index: {}]  }
   0x1   :  { %13 = vsyncpa [#allocation8], 0 }
   0x2   :  { %14 = vsyncpa [#allocation11], 0 }
   0x3   :  { %15 = vsyncpa [#allocation6], 0  ;;  %s689_s21 = smov [#allocation7]   ;;  %s690_s23 = smov [#allocation4]  }
   0x4   :  { %s35_s22 = sshll.u32 %s689_s21, 4  ;;  %s23_s24 = sshll.u32 %s690_s23, 4  ;;  %s36_s22 = int_to_ptr.vmem [resolvable:$true] %s35_s22  ;;  %s24_s24 = int_to_ptr.vmem [resolvable:$true] %s23_s24 }
   0x5   :  { %s589_s25 = scalar_lea.vmem %s36_s22, 2048  ;;  %p594_p1 = scmp.lt.s32.totalorder %s36_s22, %s36_s22 }
   0x6   :  { %p590_p0 = scmp.ne.s32.totalorder %s36_s22, %s589_s25  ;;  %p595_p2 = scmp.lt.s32.totalorder %s589_s25, %s589_s25 }
   0x8   :  { %p596_p3 = por %p595_p2, %p594_p1 }
   0xa   :  { %p597_p4 = pnand %p596_p3, %p590_p0 }
   0xc   :  { %600 = shalt.err (!%p597_p4)
}
   0xd   :  { %s691_s26 = smov 128   ;;  %s692_s27 = smov 8  }
   0xe   :  { %41 = dma.hbm_to_vmem [thread:$0]  %s777_s2, 2048, %s36_s22, [#allocation8], %s691_s26, %s691_s26, %s692_s27  }
   0xf   :  { %s609_s30 = scalar_lea.vmem %s24_s24, 256  ;;  %p614_p6 = scmp.lt.s32.totalorder %s24_s24, %s24_s24 }
  0x10   :  { %p610_p5 = scmp.ne.s32.totalorder %s24_s24, %s609_s30  ;;  %p615_p7 = scmp.lt.s32.totalorder %s609_s30, %s609_s30 }
  0x12   :  { %p616_p8 = por %p615_p7, %p614_p6 }
  0x14   :  { %p617_p9 = pnand %p616_p8, %p610_p5 }
  0x16   :  { %620 = shalt.err (!%p617_p9)
}
  0x17   :  { %29 = dma.hbm_to_vmem [thread:$0]  %s776_s1, 256, %s24_s24, [#allocation5], %s691_s26, %s691_s26, %s692_s27  }
  0x18   :  { %s693_s9 = smov [#allocation9]   ;;  %s694_s11 = smov [#allocation10]  }
  0x19   :  { %s49_s10 = sshll.u32 %s693_s9, 4  ;;  %s61_s12 = sshll.u32 %s694_s11, 4  ;;  %s50_s10 = int_to_ptr.vmem [resolvable:$true] %s49_s10  ;;  %s62_s12 = int_to_ptr.vmem [resolvable:$true] %s61_s12 }
  0x1a   :  { %s629_s2 = scalar_lea.vmem %s50_s10, 2048  ;;  %p634_p11 = scmp.lt.s32.totalorder %s50_s10, %s50_s10 }
  0x1b   :  { %p630_p10 = scmp.ne.s32.totalorder %s50_s10, %s629_s2  ;;  %p635_p12 = scmp.lt.s32.totalorder %s629_s2, %s629_s2 }
  0x1d   :  { %p636_p13 = por %p635_p12, %p634_p11 }
  0x1f   :  { %p637_p0 = pnand %p636_p13, %p630_p10 }
  0x21   :  { %640 = shalt.err (!%p637_p0)
}
  0x22   :  { %55 = dma.hbm_to_vmem [thread:$0]  %s779_s4, 2048, %s50_s10, [#allocation8], %s691_s26, %s691_s26, %s692_s27  }
  0x23   :  { %s649_s1 = scalar_lea.vmem %s62_s12, 2048  ;;  %p654_p2 = scmp.lt.s32.totalorder %s62_s12, %s62_s12 }
  0x24   :  { %p650_p1 = scmp.ne.s32.totalorder %s62_s12, %s649_s1  ;;  %p655_p3 = scmp.lt.s32.totalorder %s649_s1, %s649_s1 }
  0x26   :  { %p656_p4 = por %p655_p3, %p654_p2 }
  0x28   :  { %p657_p5 = pnand %p656_p4, %p650_p1 }
  0x2a   :  { %660 = shalt.err (!%p657_p5)
}
  0x2b   :  { %67 = dma.hbm_to_vmem [thread:$0]  %s780_s5, 2048, %s62_s12, [#allocation11], %s691_s26, %s691_s26, %s692_s27  }
  0x2c   :  { %681 = dma.done.wait [#allocation5], 256  }
  0x2d   :  { %682 = vsyncadd [#allocation5], 4294967040 }
  0x2e   :  { %683 = dma.done.wait [#allocation8], 4096  }
  0x2f   :  { %684 = vsyncadd [#allocation8], 4294963200 }
  0x30   :  { %685 = dma.done.wait [#allocation11], 2048  }
  0x31   :  { %686 = vsyncadd [#allocation11], 4294965248  ;;  %v110_v0 = vld [vmem:[#allocation9 + $0x78] sm:$0xff]  ;;  %v109_v1 = vld [vmem:[#allocation9 + $0x70] sm:$0xff]  ;;  %v195_v51 = vstv %s775_s0  ;;  %s695_s19 = smov [#allocation12]  }
  0x32   :  { %469 = vmatprep.subr.mxu0 %v110_v0  ;;  %v108_v2 = vld [vmem:[#allocation9 + $0x68] sm:$0xff]  ;;  %v107_v3 = vld [vmem:[#allocation9 + $0x60] sm:$0xff]  ;;  %v755_v4 = vld [vmem:[#allocation4] sm:$0xff]  ;;  %s400_s20 = sshll.u32 %s695_s19, 4  ;;  %s401_s20 = int_to_ptr.vmem [resolvable:$true] %s400_s20 }
  0x33   :  { %470 = vmatpush3.msra.mxu0 %v110_v0  ;;  %v106_v5 = vld [vmem:[#allocation9 + $0x58] sm:$0xff]  ;;  %501 = vmatprep.mubr.f32.mxu0 %v755_v4  ;;  %v232_v7 = vld [vmem:[#allocation10 + $0x70] sm:$0xff]  ;;  %v231_v9 = vld [vmem:[#allocation10 + $0x68] sm:$0xff]  ;;  %s661_s0 = scalar_lea.vmem %s401_s20, 256  ;;  %p666_p7 = scmp.lt.s32.totalorder %s401_s20, %s401_s20 }
  0x34   :  { %471 = vmatprep.subr.mxu0 %v109_v1  ;;  %v233_v6 = vld [vmem:[#allocation10 + $0x78] sm:$0xff]  ;;  %v105_v8 = vld [vmem:[#allocation9 + $0x50] sm:$0xff]  ;;  %v104_v10 = vld [vmem:[#allocation9 + $0x48] sm:$0xff]  ;;  %p662_p6 = scmp.ne.s32.totalorder %s401_s20, %s661_s0  ;;  %p667_p8 = scmp.lt.s32.totalorder %s661_s0, %s661_s0 }
  0x35   :  { %472 = vmatpush3.msra.mxu0 %v109_v1  ;;  %504 = vmatprep.subr.mxu1 %v233_v6  ;;  %v230_v11 = vld [vmem:[#allocation10 + $0x60] sm:$0xff]  ;;  %v229_v13 = vld [vmem:[#allocation10 + $0x58] sm:$0xff]  ;;  %v228_v15 = vld [vmem:[#allocation10 + $0x50] sm:$0xff] }
  0x36   :  { %473 = vmatprep.subr.mxu0 %v108_v2  ;;  %505 = vmatpush3.msra.mxu1 %v233_v6  ;;  %v103_v12 = vld [vmem:[#allocation9 + $0x40] sm:$0xff]  ;;  %v102_v14 = vld [vmem:[#allocation9 + $0x38] sm:$0xff]  ;;  %v101_v16 = vld [vmem:[#allocation9 + $0x30] sm:$0xff]  ;;  %p668_p9 = por %p667_p8, %p666_p7 }
  0x37   :  { %474 = vmatpush3.msra.mxu0 %v108_v2  ;;  %506 = vmatprep.subr.mxu1 %v232_v7  ;;  %v227_v17 = vld [vmem:[#allocation10 + $0x48] sm:$0xff]  ;;  %v226_v19 = vld [vmem:[#allocation10 + $0x40] sm:$0xff]  ;;  %v225_v21 = vld [vmem:[#allocation10 + $0x38] sm:$0xff] }
  0x38   :  { %475 = vmatprep.subr.mxu0 %v107_v3  ;;  %507 = vmatpush3.msra.mxu1 %v232_v7  ;;  %v100_v18 = vld [vmem:[#allocation9 + $0x28] sm:$0xff]  ;;  %v99_v20 = vld [vmem:[#allocation9 + $0x20] sm:$0xff]  ;;  %v98_v22 = vld [vmem:[#allocation9 + $0x18] sm:$0xff]  ;;  %p669_p10 = pnand %p668_p9, %p662_p6 }
  0x39   :  { %476 = vmatpush3.msra.mxu0 %v107_v3  ;;  %508 = vmatprep.subr.mxu1 %v231_v9  ;;  %v224_v23 = vld [vmem:[#allocation10 + $0x30] sm:$0xff]  ;;  %v223_v25 = vld [vmem:[#allocation10 + $0x28] sm:$0xff]  ;;  %v222_v27 = vld [vmem:[#allocation10 + $0x20] sm:$0xff] }
  0x3a   :  { %477 = vmatprep.subr.mxu0 %v106_v5  ;;  %509 = vmatpush3.msra.mxu1 %v231_v9  ;;  %v97_v24 = vld [vmem:[#allocation9 + $0x10] sm:$0xff]  ;;  %v96_v26 = vld [vmem:[#allocation9 + $0x8] sm:$0xff]  ;;  %v95_v28 = vld [vmem:[#allocation9] sm:$0xff] }
  0x3b   :  { %478 = vmatpush3.msra.mxu0 %v106_v5  ;;  %510 = vmatprep.subr.mxu1 %v230_v11  ;;  %v221_v29 = vld [vmem:[#allocation10 + $0x18] sm:$0xff]  ;;  %v214_v32 = vld [vmem:[#allocation7 + $0x70] sm:$0xff]  ;;  %v213_v33 = vld [vmem:[#allocation7 + $0x68] sm:$0xff] }
  0x3c   :  { %479 = vmatprep.subr.mxu0 %v105_v8  ;;  %511 = vmatpush3.msra.mxu1 %v230_v11  ;;  %v758_v30 = vld [vmem:[#allocation4 + $0x8] sm:$0xff]  ;;  %v212_v34 = vld [vmem:[#allocation7 + $0x60] sm:$0xff]  ;;  %v210_v36 = vld [vmem:[#allocation7 + $0x50] sm:$0xff] }
  0x3d   :  { %480 = vmatpush3.msra.mxu0 %v105_v8  ;;  %512 = vmatprep.subr.mxu1 %v229_v13  ;;  %v215_v31 = vld [vmem:[#allocation7 + $0x78] sm:$0xff]  ;;  %v209_v37 = vld [vmem:[#allocation7 + $0x48] sm:$0xff]  ;;  %v208_v38 = vld [vmem:[#allocation7 + $0x40] sm:$0xff] }
  0x3e   :  { %481 = vmatprep.subr.mxu0 %v104_v10  ;;  %513 = vmatpush3.msra.mxu1 %v229_v13  ;;  %v211_v35 = vld [vmem:[#allocation7 + $0x58] sm:$0xff]  ;;  %v206_v40 = vld [vmem:[#allocation7 + $0x30] sm:$0xff]  ;;  %v205_v41 = vld [vmem:[#allocation7 + $0x28] sm:$0xff] }
  0x3f   :  { %482 = vmatpush3.msra.mxu0 %v104_v10  ;;  %514 = vmatprep.subr.mxu1 %v228_v15  ;;  %v207_v39 = vld [vmem:[#allocation7 + $0x38] sm:$0xff]  ;;  %v204_v42 = vld [vmem:[#allocation7 + $0x20] sm:$0xff]  ;;  %v202_v44 = vld [vmem:[#allocation7 + $0x10] sm:$0xff] }
  0x40   :  { %483 = vmatprep.subr.mxu0 %v103_v12  ;;  %515 = vmatpush3.msra.mxu1 %v228_v15  ;;  %v203_v43 = vld [vmem:[#allocation7 + $0x18] sm:$0xff]  ;;  %v220_v45 = vld [vmem:[#allocation10 + $0x10] sm:$0xff]  ;;  %v201_v46 = vld [vmem:[#allocation7 + $0x8] sm:$0xff] }
  0x41   :  { %484 = vmatpush3.msra.mxu0 %v103_v12  ;;  %516 = vmatprep.subr.mxu1 %v227_v17  ;;  %v219_v47 = vld [vmem:[#allocation10 + $0x8] sm:$0xff]  ;;  %v200_v48 = vld [vmem:[#allocation7] sm:$0xff]  ;;  %v414_v57 = vld [vmem:[%s778_s3] ss:$0 sm:$0xff] }
  0x42   :  { %485 = vmatprep.subr.mxu0 %v102_v14  ;;  %517 = vmatpush3.msra.mxu1 %v227_v17  ;;  %v218_v49 = vld [vmem:[#allocation10] sm:$0xff] }
  0x43   :  { %486 = vmatpush3.msra.mxu0 %v102_v14  ;;  %518 = vmatprep.subr.mxu1 %v226_v19 }
  0x44   :  { %487 = vmatprep.subr.mxu0 %v101_v16  ;;  %519 = vmatpush3.msra.mxu1 %v226_v19 }
  0x45   :  { %488 = vmatpush3.msra.mxu0 %v101_v16  ;;  %520 = vmatprep.subr.mxu1 %v225_v21 }
  0x46   :  { %489 = vmatprep.subr.mxu0 %v100_v18  ;;  %521 = vmatpush3.msra.mxu1 %v225_v21 }
  0x47   :  { %490 = vmatpush3.msra.mxu0 %v100_v18  ;;  %522 = vmatprep.subr.mxu1 %v224_v23 }
  0x48   :  { %491 = vmatprep.subr.mxu0 %v99_v20  ;;  %523 = vmatpush3.msra.mxu1 %v224_v23 }
  0x49   :  { %492 = vmatpush3.msra.mxu0 %v99_v20  ;;  %524 = vmatprep.subr.mxu1 %v223_v25 }
  0x4a   :  { %493 = vmatprep.subr.mxu0 %v98_v22  ;;  %525 = vmatpush3.msra.mxu1 %v223_v25 }
  0x4b   :  { %494 = vmatpush3.msra.mxu0 %v98_v22  ;;  %526 = vmatprep.subr.mxu1 %v222_v27 }
  0x4c   :  { %495 = vmatprep.subr.mxu0 %v97_v24  ;;  %527 = vmatpush3.msra.mxu1 %v222_v27 }
  0x4d   :  { %496 = vmatpush3.msra.mxu0 %v97_v24  ;;  %528 = vmatprep.subr.mxu1 %v221_v29 }
  0x4e   :  { %497 = vmatprep.subr.mxu0 %v96_v26  ;;  %529 = vmatpush3.msra.mxu1 %v221_v29 }
  0x4f   :  { %498 = vmatpush3.msra.mxu0 %v96_v26  ;;  %530 = vmatprep.subr.mxu1 %v220_v45 }
  0x50   :  { %499 = vmatprep.subr.mxu0 %v95_v28  ;;  %531 = vmatpush3.msra.mxu1 %v220_v45 }
  0x51   :  { %500 = vmatpush3.msra.mxu0 %v95_v28  ;;  %532 = vmatprep.subr.mxu1 %v219_v47 }
  0x52   :  { %502 = vmatmul.mubr.f32.vlgmr.msra.gmra.mxu0 %v758_v30  ;;  %539 = vmatprep.subr.mxu0 %v215_v31 }
  0x53   :  { %540 = vmatpush3.msra.mxu0 %v215_v31  ;;  %571 = vmatprep.mubr.f32.mxu0 %v755_v4 }
  0x54   :  { %541 = vmatprep.subr.mxu0 %v214_v32  ;;  %533 = vmatpush3.msra.mxu1 %v219_v47 }
  0x55   :  { %542 = vmatpush3.msra.mxu0 %v214_v32  ;;  %534 = vmatprep.subr.mxu1 %v218_v49 }
  0x56   :  { %543 = vmatprep.subr.mxu0 %v213_v33  ;;  %535 = vmatpush3.msra.mxu1 %v218_v49 }
  0x57   :  { %544 = vmatpush3.msra.mxu0 %v213_v33 }
  0x58   :  { %545 = vmatprep.subr.mxu0 %v212_v34 }
  0x59   :  { %546 = vmatpush3.msra.mxu0 %v212_v34 }
  0x5a   :  { %547 = vmatprep.subr.mxu0 %v211_v35 }
  0x5b   :  { %548 = vmatpush3.msra.mxu0 %v211_v35 }
  0x5c   :  { %549 = vmatprep.subr.mxu0 %v210_v36 }
  0x5d   :  { %550 = vmatpush3.msra.mxu0 %v210_v36 }
  0x5e   :  { %551 = vmatprep.subr.mxu0 %v209_v37 }
  0x5f   :  { %552 = vmatpush3.msra.mxu0 %v209_v37 }
  0x60   :  { %553 = vmatprep.subr.mxu0 %v208_v38 }
  0x61   :  { %554 = vmatpush3.msra.mxu0 %v208_v38 }
  0x62   :  { %555 = vmatprep.subr.mxu0 %v207_v39 }
  0x63   :  { %556 = vmatpush3.msra.mxu0 %v207_v39 }
  0x64   :  { %557 = vmatprep.subr.mxu0 %v206_v40 }
  0x65   :  { %558 = vmatpush3.msra.mxu0 %v206_v40 }
  0x66   :  { %559 = vmatprep.subr.mxu0 %v205_v41 }
  0x67   :  { %560 = vmatpush3.msra.mxu0 %v205_v41 }
  0x68   :  { %561 = vmatprep.subr.mxu0 %v204_v42 }
  0x69   :  { %562 = vmatpush3.msra.mxu0 %v204_v42 }
  0x6a   :  { %563 = vmatprep.subr.mxu0 %v203_v43 }
  0x6b   :  { %564 = vmatpush3.msra.mxu0 %v203_v43 }
  0x6c   :  { %565 = vmatprep.subr.mxu0 %v202_v44 }
  0x6d   :  { %566 = vmatpush3.msra.mxu0 %v202_v44 }
  0x6e   :  { %567 = vmatprep.subr.mxu0 %v201_v46 }
  0x6f   :  { %568 = vmatpush3.msra.mxu0 %v201_v46 }
  0x70   :  { %569 = vmatprep.subr.mxu0 %v200_v48 }
  0x71   :  { %570 = vmatpush3.msra.mxu0 %v200_v48 }
  0x72   :  { %572 = vmatmul.mubr.f32.vlgmr.msra.gmra.mxu0 %v758_v30 }
 0x112   :  { %v503_v50 = vpop.f32.mrf.mxu0 }
 0x113   :  { %v197_v54 = vmul.f32 %v503_v50, %v195_v51 }
 0x114   :  { %v177_v52 = vpop.f32.mrf.mxu0 }
 0x115   :  { %v196_v53 = vmul.f32 %v195_v51, %v177_v52 }
 0x117   :  { %536 = vmatprep.mubr.f32.mxu1 %v196_v53 }
 0x118   :  { %537 = vmatmul.mubr.f32.vlgmr.msra.gmra.mxu1 %v197_v54 }
 0x132   :  { %v573_v55 = vpop.f32.mrf.mxu0 }
 0x134   :  { %v375_v59 = vpop.f32.mrf.mxu0 }
 0x1d8   :  { %v538_v56 = vpop.f32.mrf.mxu1 }
 0x1d9   :  { %v381_v58 = vadd.f32 %v573_v55, %v538_v56 }
 0x1da   :  { %v300_v60 = vpop.f32.mrf.mxu1 }
 0x1db   :  { %v392_v61 = vadd.f32 %v414_v57, %v381_v58  ;;  %v376_v62 = vadd.f32 %v375_v59, %v300_v60 }
 0x1dd   :  { %394 = vst [vmem:[#allocation12 + $0x8] sm:$0xff] %v392_v61  ;;  %v391_v63 = vadd.f32 %v414_v57, %v376_v62 }
 0x1df   :  { %393 = vst [vmem:[#allocation12] sm:$0xff] %v391_v63 }
 0x1e0   :  { %672 = shalt.err (!%p669_p10)
}
 0x1e1   :  { %406 = dma.vmem_to_hbm [thread:$0]  %s401_s20, 256, %s781_s6, [#allocation6], %s691_s26, %s691_s26, %s692_s27  }
 0x1e2   :  { %687 = dma.done.wait [#allocation6], 256  }
 0x1e3   :  { %688 = vsyncadd [#allocation6], 4294967040 }
 0x1e4   :  { %410 = vsyncpa [#allocation5], 1 }
 0x1e5   :  { %411 = vsyncpa [#allocation8], 1 }
 0x1e6   :  { %412 = vsyncpa [#allocation11], 1 }
 0x1e7   :  { %413 = vsyncpa [#allocation6], 1 }

</bundles_post_ra>
